<compile_context>
chip_gen: v5e
topology: v5e:2x2
jax: 0.10.0
libtpu: 0.0.40
codegen_flags: <defaults>
</compile_context>

<pallas_src>
import functools

import jax
import jax.numpy as jnp
from jax.experimental import pallas as pl
from jax.experimental.pallas import tpu as pltpu

LANE = 128                 # vreg lane width
SUB = 8                    # vreg sublane count
MAX_BLOCK_TILES = 256      # 256 * 8 * 128 * 4B = 1 MiB f32 per input per block
NUM_SHARDS = 2             # leading "parallel" grid axis (2 TCs on v7x)


def _cdiv(a, b):
    return -(-a // b)


def _plan(n_elems):
    """Static packing plan (block_tiles, steps, total_tiles) from element count."""
    tiles = max(1, _cdiv(n_elems, SUB * LANE))
    tiles_per_shard = _cdiv(tiles, NUM_SHARDS)
    steps = _cdiv(tiles_per_shard, MAX_BLOCK_TILES)
    block_tiles = _cdiv(tiles_per_shard, steps)     # minimizes zero padding
    total_tiles = NUM_SHARDS * steps * block_tiles
    return block_tiles, steps, total_tiles


def _pack_flat(arrays):
    """Flatten + concat + zero-pad into a lane-dense (total_tiles, 8, 128) slab."""
    flat = jnp.concatenate([jnp.ravel(a) for a in arrays])
    n = flat.shape[0]
    block_tiles, steps, total_tiles = _plan(n)
    pad = total_tiles * SUB * LANE - n
    flat = jnp.pad(flat, (0, pad))
    slab = flat.reshape(total_tiles, SUB, LANE)
    return slab, (block_tiles, steps)


# ----------------------------------------------------------------------------
# Pallas kernels: per-shard accumulation of 0.5 * sum((a - b)^2) / 0.5 * sum(a^2)
# The resident (1, 8, 128) output block is the accumulator.
# ----------------------------------------------------------------------------
def _sumsq_diff_kernel(a_ref, b_ref, o_ref):
    i = pl.program_id(1)

    @pl.when(i == 0)
    def _():
        o_ref[...] = jnp.zeros_like(o_ref)

    d = a_ref[...].astype(jnp.float32) - b_ref[...].astype(jnp.float32)
    # (block_tiles, 8, 128) -> (1, 8, 128): elementwise vreg adds on the VPU.
    o_ref[...] += jnp.sum(d * d, axis=0, keepdims=True)

    @pl.when(i == pl.num_programs(1) - 1)
    def _():
        o_ref[...] = o_ref[...] * 0.5


def _sumsq_kernel(a_ref, o_ref):
    i = pl.program_id(1)

    @pl.when(i == 0)
    def _():
        o_ref[...] = jnp.zeros_like(o_ref)

    a = a_ref[...].astype(jnp.float32)
    o_ref[...] += jnp.sum(a * a, axis=0, keepdims=True)

    @pl.when(i == pl.num_programs(1) - 1)
    def _():
        o_ref[...] = o_ref[...] * 0.5


# ----------------------------------------------------------------------------
# pallas_call wrappers
# ----------------------------------------------------------------------------
def _half_sumsq_diff_call(a_slab, b_slab, block_tiles, steps):
    out = pl.pallas_call(
        _sumsq_diff_kernel,
        out_shape=jax.ShapeDtypeStruct((NUM_SHARDS, SUB, LANE), jnp.float32),
        grid_spec=pltpu.PrefetchScalarGridSpec(
            num_scalar_prefetch=0,
            grid=(NUM_SHARDS, steps),
            in_specs=[
                pl.BlockSpec((block_tiles, SUB, LANE),
                             lambda c, i: (c * steps + i, 0, 0)),
                pl.BlockSpec((block_tiles, SUB, LANE),
                             lambda c, i: (c * steps + i, 0, 0)),
            ],
            out_specs=pl.BlockSpec((1, SUB, LANE), lambda c, i: (c, 0, 0)),
        ),
        compiler_params=pltpu.CompilerParams(
            dimension_semantics=("parallel", "arbitrary")),
    )(a_slab, b_slab)
    return jnp.sum(out)


def _half_sumsq_call(a_slab, block_tiles, steps):
    out = pl.pallas_call(
        _sumsq_kernel,
        out_shape=jax.ShapeDtypeStruct((NUM_SHARDS, SUB, LANE), jnp.float32),
        grid_spec=pltpu.PrefetchScalarGridSpec(
            num_scalar_prefetch=0,
            grid=(NUM_SHARDS, steps),
            in_specs=[
                pl.BlockSpec((block_tiles, SUB, LANE),
                             lambda c, i: (c * steps + i, 0, 0)),
            ],
            out_specs=pl.BlockSpec((1, SUB, LANE), lambda c, i: (c, 0, 0)),
        ),
        compiler_params=pltpu.CompilerParams(
            dimension_semantics=("parallel", "arbitrary")),
    )(a_slab)
    return jnp.sum(out)


@jax.jit
def _towards_pretrained(model_arrays, pre_slab):
    a_slab, (block_tiles, steps) = _pack_flat(model_arrays)
    assert a_slab.shape == pre_slab.shape  # trace-time shape check
    return _half_sumsq_diff_call(a_slab, pre_slab, block_tiles, steps)


@jax.jit
def _towards_zero(model_arrays):
    a_slab, (block_tiles, steps) = _pack_flat(model_arrays)
    return _half_sumsq_call(a_slab, block_tiles, steps)


# ----------------------------------------------------------------------------
# L2-SP module (mirrors the PyTorch L2_SP forward semantics)
# ----------------------------------------------------------------------------
def should_decay_parameter(name, param) -> bool:
    # TODO(synk): `requires_grad` has no JAX-array equivalent; all params are
    # assumed trainable here.
    lname = name.lower()
    if "batchnorm" in lname or "bn" in lname or "bias" in lname:
        return False
    if param.ndim == 1:
        return False
    return True


def get_keys_to_decay(params: dict) -> list:
    return [k for k, v in params.items() if should_decay_parameter(k, v)]


class L2SP:
    """alpha * 0.5*||w - w_pre||^2 (shared keys)  +  beta * 0.5*||w||^2 (new keys)."""

    def __init__(self, model_params: dict, pretrained_params: dict,
                 alpha: float, beta: float):
        self.alpha = float(alpha)
        self.beta = float(beta)
        to_decay = get_keys_to_decay(model_params)
        self.pretrained_keys, self.new_keys = [], []
        for k in to_decay:
            if (k in pretrained_params
                    and model_params[k].shape == pretrained_params[k].shape):
                self.pretrained_keys.append(k)
            else:
                self.new_keys.append(k)

        # Cache the packed pretrained slab: constant across training steps.
        if self.pretrained_keys:
            self._pre_slab, self._pre_meta = _pack_flat(
                [pretrained_params[k] for k in self.pretrained_keys])
            self._pre_slab = jax.block_until_ready(self._pre_slab)
        else:
            self._pre_slab, self._pre_meta = None, None

    def __call__(self, model_params: dict, check_nan: bool = True):
        if self.pretrained_keys:
            towards_pretrained = _towards_pretrained(
                [model_params[k] for k in self.pretrained_keys], self._pre_slab)
        else:
            towards_pretrained = jnp.float32(0.0)

        if self.new_keys:
            towards_0 = _towards_zero(
                [model_params[k] for k in self.new_keys])
        else:
            towards_0 = jnp.float32(0.0)

        if check_nan:
            # Both kernels are already dispatched; one combined device->host
            # transfer mirrors PyTorch's `if x != x: raise ValueError`.
            tp, t0 = jax.device_get(jnp.stack([towards_pretrained, towards_0]))
            if tp != tp or t0 != t0:
                raise ValueError(
                    "invalid loss in L2-SP: towards pretrained: "
                    f"{tp} towards 0: {t0}")

        return towards_pretrained * self.alpha + towards_0 * self.beta


# ----------------------------------------------------------------------------
# Example / test
# ----------------------------------------------------------------------------
if __name__ == "__main__":
    key = jax.random.PRNGKey(0)
    k = jax.random.split(key, 6)

    # Small synthetic model: conv weights (OIHW) + a new fc head (out, in).
    model_params = {
        "conv1.weight": jax.random.normal(k[0], (4, 3, 3, 3), jnp.float32),
        "layer1.conv.weight": jax.random.normal(k[1], (8, 4, 3, 3), jnp.float32),
        "fc.weight": jax.random.normal(k[2], (10, 32), jnp.float32),
        "fc.bias": jax.random.normal(k[5], (10,), jnp.float32),     # excluded
    }
    # Pretrained checkpoint only contains the backbone (not the new fc head).
    pretrained_params = {
        "conv1.weight": jax.random.normal(k[3], (4, 3, 3, 3), jnp.float32),
        "layer1.conv.weight": jax.random.normal(k[4], (8, 4, 3, 3), jnp.float32),
    }

    alpha, beta = 1e-4, 1e-3
    reg = L2SP(model_params, pretrained_params, alpha, beta)

    loss = reg(model_params)
    loss = jax.block_until_ready(loss)

    # Pure-JAX reference for sanity.
    ref_tp = sum(0.5 * jnp.sum((model_params[kk] - pretrained_params[kk]) ** 2)
                 for kk in reg.pretrained_keys)
    ref_t0 = sum(0.5 * jnp.sum(model_params[kk] ** 2) for kk in reg.new_keys)
    ref = ref_tp * alpha + ref_t0 * beta
    assert jnp.allclose(loss, ref, rtol=1e-5, atol=1e-6), (loss, ref)

    print("KERNEL_OK")
</pallas_src>

<mosaic_0001>
module attributes {stable_mosaic.version = 11 : i64} {
  func.func @_sumsq_diff_kernel(%arg0: i32, %arg1: i32, %arg2: memref<1x8x128xf32, #tpu.memory_space<vmem>>, %arg3: memref<1x8x128xf32, #tpu.memory_space<vmem>>, %arg4: memref<1x8x128xf32, #tpu.memory_space<vmem>>) attributes {dimension_semantics = [#tpu.dimension_semantics<parallel>, #tpu.dimension_semantics<arbitrary>], iteration_bounds = array<i64: 2, 1>, scalar_prefetch = 0 : i64, scratch_operands = 0 : i64, tpu.core_type = #tpu.core_type<tc>, window_params = [{transform_indices = @transform_0, window_bounds = array<i64: 1, 8, 128>}, {transform_indices = @transform_1, window_bounds = array<i64: 1, 8, 128>}, {transform_indices = @transform_2, window_bounds = array<i64: 1, 8, 128>}]} {
    %c0_i32 = arith.constant 0 : i32
    %0 = arith.cmpi eq, %arg1, %c0_i32 : i32
    %1 = arith.extui %0 : i1 to i32
    %c0_i32_0 = arith.constant 0 : i32
    %2 = arith.cmpi ne, %1, %c0_i32_0 : i32
    scf.if %2 {
      %cst_14 = arith.constant 0.000000e+00 : f32
      %15 = vector.broadcast %cst_14 : f32 to vector<1x8x128xf32>
      %c0_15 = arith.constant 0 : index
      %c0_16 = arith.constant 0 : index
      %c0_17 = arith.constant 0 : index
      %16 = vector.load %arg4[%c0_15, %c0_16, %c0_17] : memref<1x8x128xf32, #tpu.memory_space<vmem>>, vector<1x8x128xf32>
      tpu.vector_store %arg4[%c0_15, %c0_16, %c0_17], %15 {strides = array<i32>} : memref<1x8x128xf32, #tpu.memory_space<vmem>>, vector<1x8x128xf32>,
    } else {
    }
    %c0 = arith.constant 0 : index
    %c0_1 = arith.constant 0 : index
    %c0_2 = arith.constant 0 : index
    %3 = vector.load %arg2[%c0, %c0_1, %c0_2] : memref<1x8x128xf32, #tpu.memory_space<vmem>>, vector<1x8x128xf32>
    %c0_3 = arith.constant 0 : index
    %c0_4 = arith.constant 0 : index
    %c0_5 = arith.constant 0 : index
    %4 = vector.load %arg3[%c0_3, %c0_4, %c0_5] : memref<1x8x128xf32, #tpu.memory_space<vmem>>, vector<1x8x128xf32>
    %5 = arith.subf %3, %4 : vector<1x8x128xf32>
    %c0_6 = arith.constant 0 : index
    %c0_7 = arith.constant 0 : index
    %c0_8 = arith.constant 0 : index
    %6 = vector.load %arg4[%c0_6, %c0_7, %c0_8] : memref<1x8x128xf32, #tpu.memory_space<vmem>>, vector<1x8x128xf32>
    %7 = arith.mulf %5, %5 : vector<1x8x128xf32>
    %cst = arith.constant dense<0.000000e+00> : vector<8x128xf32>
    %8 = vector.multi_reduction <add>, %7, %cst [0] : vector<1x8x128xf32> to vector<8x128xf32>
    %9 = vector.shape_cast %8 : vector<8x128xf32> to vector<1x8x128xf32>
    %10 = arith.addf %6, %9 : vector<1x8x128xf32>
    %c0_9 = arith.constant 0 : index
    %c0_10 = arith.constant 0 : index
    %c0_11 = arith.constant 0 : index
    %11 = vector.load %arg4[%c0_9, %c0_10, %c0_11] : memref<1x8x128xf32, #tpu.memory_space<vmem>>, vector<1x8x128xf32>
    tpu.vector_store %arg4[%c0_9, %c0_10, %c0_11], %10 {strides = array<i32>} : memref<1x8x128xf32, #tpu.memory_space<vmem>>, vector<1x8x128xf32>,
    %c0_i32_12 = arith.constant 0 : i32
    %12 = arith.cmpi eq, %arg1, %c0_i32_12 : i32
    %13 = arith.extui %12 : i1 to i32
    %c0_i32_13 = arith.constant 0 : i32
    %14 = arith.cmpi ne, %13, %c0_i32_13 : i32
    scf.if %14 {
      %c0_14 = arith.constant 0 : index
      %c0_15 = arith.constant 0 : index
      %c0_16 = arith.constant 0 : index
      %15 = vector.load %arg4[%c0_14, %c0_15, %c0_16] : memref<1x8x128xf32, #tpu.memory_space<vmem>>, vector<1x8x128xf32>
      %cst_17 = arith.constant 5.000000e-01 : f32
      %16 = vector.broadcast %cst_17 : f32 to vector<1x8x128xf32>
      %17 = arith.mulf %15, %16 : vector<1x8x128xf32>
      %c0_18 = arith.constant 0 : index
      %c0_19 = arith.constant 0 : index
      %c0_20 = arith.constant 0 : index
      %18 = vector.load %arg4[%c0_18, %c0_19, %c0_20] : memref<1x8x128xf32, #tpu.memory_space<vmem>>, vector<1x8x128xf32>
      tpu.vector_store %arg4[%c0_18, %c0_19, %c0_20], %17 {strides = array<i32>} : memref<1x8x128xf32, #tpu.memory_space<vmem>>, vector<1x8x128xf32>,
    } else {
    }
    return
  }
  func.func @transform_0(%arg0: i32, %arg1: i32) -> (i32, i32, i32) {
    %c1_i32 = arith.constant 1 : i32
    %0 = arith.muli %arg0, %c1_i32 : i32
    %1 = arith.addi %0, %arg1 : i32
    %c0_i32 = arith.constant 0 : i32
    %c0_i32_0 = arith.constant 0 : i32
    %c0_i32_1 = arith.constant 0 : i32
    return %1, %c0_i32, %c0_i32_0 : i32, i32, i32
  }
  func.func @transform_1(%arg0: i32, %arg1: i32) -> (i32, i32, i32) {
    %c1_i32 = arith.constant 1 : i32
    %0 = arith.muli %arg0, %c1_i32 : i32
    %1 = arith.addi %0, %arg1 : i32
    %c0_i32 = arith.constant 0 : i32
    %c0_i32_0 = arith.constant 0 : i32
    %c0_i32_1 = arith.constant 0 : i32
    return %1, %c0_i32, %c0_i32_0 : i32, i32, i32
  }
  func.func @transform_2(%arg0: i32, %arg1: i32) -> (i32, i32, i32) {
    %c0_i32 = arith.constant 0 : i32
    %c0_i32_0 = arith.constant 0 : i32
    %c0_i32_1 = arith.constant 0 : i32
    return %arg0, %c0_i32, %c0_i32_0 : i32, i32, i32
  }
}

</mosaic_0001>

<bundles_post_ra>
// kernel: _towards_pretrained.1
= control target key start
LH: loop header
LB: loop body
LE: loop exit
PB: predicated region body
PF: predicated region fallthrough
CT: control target
= control target key end

     0   :  { %s348_s9 = smov 0   ;;  %s350_s10 = smov 0   ;;  %s372_s0 = inlined_call_operand.vmem [shape: f32[2,8,128], index: 0, kind: input, shape index: {}]   ;;  %s373_s1 = inlined_call_operand.vmem [shape: f32[2,8,128], index: 1, kind: input, shape index: {}]   ;;  %s374_s2 = inlined_call_operand.vmem [shape: f32[2,8,128], index: 2, kind: output, shape index: {}]  }
   0x1   :  { %s352_s11 = smov 0  }
   0x2 LB: > { %s24_s12 = sadd.s32 1, %s327_s10  ;;  %p278_p0 = scmp.ge.s32.totalorder %s331_s11, 1  ;;  %s331_s11 = sphi %s352_s11, %s12_s11   ;;  %s327_s10 = sphi %s350_s10, %s376_s10   ;;  %s323_s9 = sphi %s348_s9, %s375_s9  }
   0x3   : > { %p26_p1 = scmp.ge.s32.totalorder %s24_s12, 2  ;;  %p140_p2 = scmp.lt.s32.totalorder %s331_s11, 3 }
   0x5   : > { %s378_s12 = smov (%p26_p1, %s24_s12), 0  ;;  %p141_p3 = pnand %p278_p0, %p140_p2 }
   0x6   : > { %p167_p4 = scmp.lt.s32.totalorder (!%p141_p3), %s323_s9, 1 }
   0x7   : > { %144 = sbr.rel (%p141_p3) target bundleno = 24 (0x18), region = 28 }
   0xc   : > { %s380_s9 = smov (!%p167_p4, %s323_s9), 1 }
   0xd   : > { %s279_s13 = sshll.u32 %s380_s9, 3 }
   0xe   : > { %s170_s16 = scalar_lea.vmem %s372_s0, %s279_s13  ;;  %s176_s19 = scalar_lea.vmem %s373_s1, %s279_s13 }
   0xf   : > { %v187_v0 = vld [vmem:[%s170_s16] sm:$0xff]  ;;  %s181_s22 = scalar_lea.vmem %s374_s2, %s279_s13 }
  0x10   : > { %v188_v1 = vld [vmem:[%s176_s19] sm:$0xff] }
  0x11   : > { %v189_v2 = vsub.f32 %v187_v0, %v188_v1 }
  0x13   : > { %v191_v3 = vmul.f32 %v189_v2, %v189_v2 }
  0x15   : > { %v199_v4 = vmul.f32 0.5, %v191_v3 }
  0x17   : > { %200 = vst [vmem:[%s181_s22] sm:$0xff] %v199_v4 }
  0x18 PF: > { %s12_s11 = sadd.s32 1, %s331_s11   ;;  %s375_s9 = smov %s327_s10 }
  0x19   : > { %p9_p5 = scmp.ge.s32.totalorder %s12_s11, 4   ;;  %s376_s10 = smov %s378_s12 }
  0x1b   :  { %11 = sbr.rel (!%p9_p5) target bundleno = 2 (0x2), region = 69 }

</bundles_post_ra>
